<compile_context>
chip_gen: v7x
topology: tpu7x:2x2x1
jax: 0.10.0
libtpu: 0.0.40
codegen_flags: <defaults>
</compile_context>

<pallas_src>
import functools

import jax
import jax.numpy as jnp
from jax.experimental import pallas as pl
from jax.experimental.pallas import tpu as pltpu


HIDDEN = 200        # logical hidden size (nn.Linear(..., 200))
HIDDEN_PAD = 256    # MXU/lane-native padded hidden size
LANE = 128          # lane width: last dims kept multiples of this


def _round_up(x, m):
    return ((x + m - 1) // m) * m


def _preferred_tile_rows():
    """Generation-aware row-tile size (see perf review)."""
    try:
        kind = jax.devices()[0].device_kind.lower()
    except Exception:
        return 256
    if "v5 lite" in kind or "v5e" in kind or "v5lite" in kind:
        return 128   # 128-row MXU; halves live (TM,256) f32 intermediates
    if "v6" in kind:
        return 512   # ample VMEM; fewer grid steps at large M
    return 256       # v4/v5p/v7x default (256-row MXU)


def _mlp_kernel(x_ref, w1_ref, b1_ref, w2_ref, b2_ref, w3_ref, b3_ref,
                w4_ref, b4_ref, o_ref):
    x = x_ref[...]                                               # (TM, 2) f32

    # first_layer + ReLU.  K=2 contraction as a VPU outer product (keeps the
    # MXU free for the wide layers; no need to pad K=2 up to MXU width).
    h = (x[:, 0:1] * w1_ref[0:1, :]
         + x[:, 1:2] * w1_ref[1:2, :]
         + b1_ref[...])
    h = jnp.maximum(h, 0.0)                                      # (TM, 256) f32

    # residual + ReLU(second_layer): bf16 MXU operands, f32 accumulation,
    # bias/residual math in f32.
    h2 = jnp.dot(h.astype(jnp.bfloat16), w2_ref[...],
                 preferred_element_type=jnp.float32) + b2_ref[...]
    h = h + jnp.maximum(h2, 0.0)

    # residual + ReLU(third_layer)
    h3 = jnp.dot(h.astype(jnp.bfloat16), w3_ref[...],
                 preferred_element_type=jnp.float32) + b3_ref[...]
    h = h + jnp.maximum(h3, 0.0)

    # fourth_layer + sigmoid
    y = jnp.dot(h.astype(jnp.bfloat16), w4_ref[...],
                preferred_element_type=jnp.float32) + b4_ref[...]
    o_ref[...] = jax.nn.sigmoid(y).astype(o_ref.dtype)           # (TM, out_pad)


def prepare_params(params, input_dim):
    """One-time preprocessing: pad to MXU/lane-native sizes, cast wide-layer
    weights to bf16.  Call ONCE outside the per-step forward.

    Zero padding is exact: padded hidden channels get zero weight rows/cols
    and zero bias, so they are 0 pre-ReLU and stay 0 through the residual
    chain; padded output columns are dropped after the kernel.
    """
    out_dim = input_dim[0] * input_dim[1]
    out_dim_pad = _round_up(out_dim, LANE)
    hp = HIDDEN_PAD - HIDDEN
    op = out_dim_pad - out_dim
    f32, bf16 = jnp.float32, jnp.bfloat16
    return {
        # layer 1 stays f32 (VPU outer-product path)
        "w1": jnp.pad(params["w1"].astype(f32), ((0, 0), (0, hp))),
        "b1": jnp.pad(params["b1"].astype(f32), ((0, 0), (0, hp))),
        # wide layers: bf16 weights for the MXU, f32 biases
        "w2": jnp.pad(params["w2"].astype(f32), ((0, hp), (0, hp))).astype(bf16),
        "b2": jnp.pad(params["b2"].astype(f32), ((0, 0), (0, hp))),
        "w3": jnp.pad(params["w3"].astype(f32), ((0, hp), (0, hp))).astype(bf16),
        "b3": jnp.pad(params["b3"].astype(f32), ((0, 0), (0, hp))),
        "w4": jnp.pad(params["w4"].astype(f32), ((0, hp), (0, op))).astype(bf16),
        "b4": jnp.pad(params["b4"].astype(f32), ((0, 0), (0, op))),
    }


@functools.partial(jax.jit, static_argnames=("input_dim",))
def generative_model_forward(latent_batch, padded_params, *, input_dim):
    """Pallas implementation of GenerativeModel.forward.

    latent_batch: (B, T, 2) float32
    padded_params: output of prepare_params() (padded, wide weights in bf16)
    returns: (B, T, input_dim[0], input_dim[1]) float32
    """
    B, T, ode_dim = latent_batch.shape
    assert ode_dim == 2
    H, W = input_dim
    out_dim = H * W
    out_dim_pad = _round_up(out_dim, LANE)
    M = B * T

    x = latent_batch.reshape(M, ode_dim).astype(jnp.float32)

    # Row-tile selection (all static): a single grid step only for truly
    # tiny M; otherwise at least 2 grid steps (keeps both v7x TensorCores
    # busy), capped at the generation-preferred MXU-aligned tile.
    preferred_tm = _preferred_tile_rows()
    if M <= 8:
        TM = _round_up(max(M, 1), 8)
    elif M <= 2 * preferred_tm:
        TM = _round_up(_round_up(M, 8) // 2, 8)     # ~2 row tiles
    else:
        TM = preferred_tm
    M_pad = _round_up(M, TM)
    if M_pad != M:
        x = jnp.pad(x, ((0, M_pad - M), (0, 0)))

    p = padded_params
    w1, b1 = p["w1"], p["b1"]
    w2, b2 = p["w2"], p["b2"]
    w3, b3 = p["w3"], p["b3"]
    w4, b4 = p["w4"], p["b4"]

    # Weights / biases replicated across the row-tile grid (constant block
    # index -> Pallas DMAs them once).
    def full_spec(arr):
        return pl.BlockSpec(arr.shape, lambda i: (0, 0))

    out = pl.pallas_call(
        _mlp_kernel,
        out_shape=jax.ShapeDtypeStruct((M_pad, out_dim_pad), jnp.float32),
        grid_spec=pltpu.PrefetchScalarGridSpec(
            num_scalar_prefetch=0,
            grid=(M_pad // TM,),
            in_specs=[
                pl.BlockSpec((TM, ode_dim), lambda i: (i, 0)),   # x row tile
                full_spec(w1), full_spec(b1),
                full_spec(w2), full_spec(b2),
                full_spec(w3), full_spec(b3),
                full_spec(w4), full_spec(b4),
            ],
            out_specs=pl.BlockSpec((TM, out_dim_pad), lambda i: (i, 0)),
        ),
        compiler_params=pltpu.CompilerParams(
            dimension_semantics=("parallel",)),
    )(x, w1, b1, w2, b2, w3, b3, w4, b4)

    # Only slice (HBM re-read/re-write of the output) when padding was
    # actually applied; the common 16x16 / multiple-of-8 case skips it.
    if M_pad != M or out_dim_pad != out_dim:
        out = out[:M, :out_dim]
    return out.reshape(B, T, H, W)


def init_params(key, input_dim):
    """Deterministic init mimicking nn.Linear's U(-1/sqrt(fan_in), 1/sqrt(fan_in))."""
    H, W = input_dim
    dims = [(2, HIDDEN), (HIDDEN, HIDDEN), (HIDDEN, HIDDEN), (HIDDEN, H * W)]
    params = {}
    for idx, (fan_in, fan_out) in enumerate(dims, start=1):
        key, kw, kb = jax.random.split(key, 3)
        bound = 1.0 / jnp.sqrt(float(fan_in))
        # stored as (in, out) so the kernel computes x @ W + b
        params[f"w{idx}"] = jax.random.uniform(
            kw, (fan_in, fan_out), jnp.float32, -bound, bound)
        params[f"b{idx}"] = jax.random.uniform(
            kb, (1, fan_out), jnp.float32, -bound, bound)
    return params


def reference_forward(latent_batch, params, input_dim):
    """Pure-JAX f32 reference matching the PyTorch forward."""
    B, T, _ = latent_batch.shape
    x = latent_batch.reshape(B * T, 2)
    h = jax.nn.relu(x @ params["w1"] + params["b1"])
    h = h + jax.nn.relu(h @ params["w2"] + params["b2"])
    h = h + jax.nn.relu(h @ params["w3"] + params["b3"])
    y = jax.nn.sigmoid(h @ params["w4"] + params["b4"])
    return y.reshape(B, T, input_dim[0], input_dim[1])


if __name__ == "__main__":
    key = jax.random.PRNGKey(0)
    input_dim = (16, 16)           # GenerativeModel(input_dim=(16, 16))
    B, T = 2, 8                    # latent_batch: (batch, seq, ode_dim=2)

    key, kx = jax.random.split(key)
    latent_batch = jax.random.normal(kx, (B, T, 2), jnp.float32)
    raw_params = init_params(key, input_dim)

    # One-time preprocessing (pad to MXU sizes + bf16 weight cast); the
    # per-call forward only sees already-padded params.
    params = prepare_params(raw_params, input_dim)

    out = generative_model_forward(latent_batch, params, input_dim=input_dim)
    out = jax.block_until_ready(out)

    ref = reference_forward(latent_batch, raw_params, input_dim)
    assert out.shape == (B, T, input_dim[0], input_dim[1])
    # bf16 MXU operands with f32 accumulation: relaxed tolerance vs the
    # all-f32 reference (sigmoid output in [0, 1]).
    max_err = float(jnp.max(jnp.abs(out - ref)))
    assert jnp.allclose(out, ref, atol=2e-2, rtol=2e-2), max_err

    print("KERNEL_OK")
</pallas_src>

<mosaic_0001>
module attributes {stable_mosaic.version = 11 : i64} {
  func.func @_mlp_kernel(%arg0: i32, %arg1: memref<8x2xf32, #tpu.memory_space<vmem>>, %arg2: memref<2x256xf32, #tpu.memory_space<vmem>>, %arg3: memref<1x256xf32, #tpu.memory_space<vmem>>, %arg4: memref<256x256xbf16, #tpu.memory_space<vmem>>, %arg5: memref<1x256xf32, #tpu.memory_space<vmem>>, %arg6: memref<256x256xbf16, #tpu.memory_space<vmem>>, %arg7: memref<1x256xf32, #tpu.memory_space<vmem>>, %arg8: memref<256x256xbf16, #tpu.memory_space<vmem>>, %arg9: memref<1x256xf32, #tpu.memory_space<vmem>>, %arg10: memref<8x256xf32, #tpu.memory_space<vmem>>) attributes {dimension_semantics = [#tpu.dimension_semantics<parallel>], iteration_bounds = array<i64: 2>, scalar_prefetch = 0 : i64, scratch_operands = 0 : i64, tpu.core_type = #tpu.core_type<tc>, window_params = [{transform_indices = @transform_0, window_bounds = array<i64: 8, 2>}, {pipeline_mode = #tpu.pipeline_mode<synchronous>, transform_indices = @transform_1, window_bounds = array<i64: 2, 256>}, {pipeline_mode = #tpu.pipeline_mode<synchronous>, transform_indices = @transform_2, window_bounds = array<i64: 1, 256>}, {pipeline_mode = #tpu.pipeline_mode<synchronous>, transform_indices = @transform_3, window_bounds = array<i64: 256, 256>}, {pipeline_mode = #tpu.pipeline_mode<synchronous>, transform_indices = @transform_4, window_bounds = array<i64: 1, 256>}, {pipeline_mode = #tpu.pipeline_mode<synchronous>, transform_indices = @transform_5, window_bounds = array<i64: 256, 256>}, {pipeline_mode = #tpu.pipeline_mode<synchronous>, transform_indices = @transform_6, window_bounds = array<i64: 1, 256>}, {pipeline_mode = #tpu.pipeline_mode<synchronous>, transform_indices = @transform_7, window_bounds = array<i64: 256, 256>}, {pipeline_mode = #tpu.pipeline_mode<synchronous>, transform_indices = @transform_8, window_bounds = array<i64: 1, 256>}, {transform_indices = @transform_9, window_bounds = array<i64: 8, 256>}]} {
    %c0 = arith.constant 0 : index
    %c0_0 = arith.constant 0 : index
    %0 = vector.load %arg1[%c0, %c0_0] : memref<8x2xf32, #tpu.memory_space<vmem>>, vector<8x2xf32>
    %1 = vector.extract_strided_slice %0 {offsets = [0, 0], sizes = [8, 1], strides = [1, 1]} : vector<8x2xf32> to vector<8x1xf32>
    %c0_1 = arith.constant 0 : index
    %c0_2 = arith.constant 0 : index
    %2 = vector.load %arg2[%c0_1, %c0_2] : memref<2x256xf32, #tpu.memory_space<vmem>>, vector<1x256xf32>
    %3 = vector.broadcast %1 : vector<8x1xf32> to vector<8x256xf32>
    %4 = vector.broadcast %2 : vector<1x256xf32> to vector<8x256xf32>
    %5 = arith.mulf %3, %4 : vector<8x256xf32>
    %6 = vector.extract_strided_slice %0 {offsets = [0, 1], sizes = [8, 1], strides = [1, 1]} : vector<8x2xf32> to vector<8x1xf32>
    %c1 = arith.constant 1 : index
    %c0_3 = arith.constant 0 : index
    %7 = vector.load %arg2[%c1, %c0_3] : memref<2x256xf32, #tpu.memory_space<vmem>>, vector<1x256xf32>
    %8 = vector.broadcast %6 : vector<8x1xf32> to vector<8x256xf32>
    %9 = vector.broadcast %7 : vector<1x256xf32> to vector<8x256xf32>
    %10 = arith.mulf %8, %9 : vector<8x256xf32>
    %11 = arith.addf %5, %10 : vector<8x256xf32>
    %c0_4 = arith.constant 0 : index
    %c0_5 = arith.constant 0 : index
    %12 = vector.load %arg3[%c0_4, %c0_5] : memref<1x256xf32, #tpu.memory_space<vmem>>, vector<1x256xf32>
    %13 = vector.broadcast %12 : vector<1x256xf32> to vector<8x256xf32>
    %14 = arith.addf %11, %13 : vector<8x256xf32>
    %cst = arith.constant 0.000000e+00 : f32
    %15 = vector.broadcast %cst : f32 to vector<8x256xf32>
    %16 = arith.maximumf %14, %15 : vector<8x256xf32>
    %17 = arith.truncf %16 : vector<8x256xf32> to vector<8x256xbf16>
    %c0_6 = arith.constant 0 : index
    %c0_7 = arith.constant 0 : index
    %18 = vector.load %arg4[%c0_6, %c0_7] : memref<256x256xbf16, #tpu.memory_space<vmem>>, vector<256x256xbf16>
    %cst_8 = arith.constant dense<0.000000e+00> : vector<8x256xf32>
    %19 = tpu.matmul %17, %18, %cst_8 {dimension_numbers = #tpu.dot_dimension_numbers<[1], [0], [0], [1], [0, 0, 1, 1], [], []>} : vector<8x256xbf16>, vector<256x256xbf16>, vector<8x256xf32> -> vector<8x256xf32>
    %c0_9 = arith.constant 0 : index
    %c0_10 = arith.constant 0 : index
    %20 = vector.load %arg5[%c0_9, %c0_10] : memref<1x256xf32, #tpu.memory_space<vmem>>, vector<1x256xf32>
    %21 = vector.broadcast %20 : vector<1x256xf32> to vector<8x256xf32>
    %22 = arith.addf %19, %21 : vector<8x256xf32>
    %cst_11 = arith.constant 0.000000e+00 : f32
    %23 = vector.broadcast %cst_11 : f32 to vector<8x256xf32>
    %24 = arith.maximumf %22, %23 : vector<8x256xf32>
    %25 = arith.addf %16, %24 : vector<8x256xf32>
    %26 = arith.truncf %25 : vector<8x256xf32> to vector<8x256xbf16>
    %c0_12 = arith.constant 0 : index
    %c0_13 = arith.constant 0 : index
    %27 = vector.load %arg6[%c0_12, %c0_13] : memref<256x256xbf16, #tpu.memory_space<vmem>>, vector<256x256xbf16>
    %cst_14 = arith.constant dense<0.000000e+00> : vector<8x256xf32>
    %28 = tpu.matmul %26, %27, %cst_14 {dimension_numbers = #tpu.dot_dimension_numbers<[1], [0], [0], [1], [0, 0, 1, 1], [], []>} : vector<8x256xbf16>, vector<256x256xbf16>, vector<8x256xf32> -> vector<8x256xf32>
    %c0_15 = arith.constant 0 : index
    %c0_16 = arith.constant 0 : index
    %29 = vector.load %arg7[%c0_15, %c0_16] : memref<1x256xf32, #tpu.memory_space<vmem>>, vector<1x256xf32>
    %30 = vector.broadcast %29 : vector<1x256xf32> to vector<8x256xf32>
    %31 = arith.addf %28, %30 : vector<8x256xf32>
    %cst_17 = arith.constant 0.000000e+00 : f32
    %32 = vector.broadcast %cst_17 : f32 to vector<8x256xf32>
    %33 = arith.maximumf %31, %32 : vector<8x256xf32>
    %34 = arith.addf %25, %33 : vector<8x256xf32>
    %35 = arith.truncf %34 : vector<8x256xf32> to vector<8x256xbf16>
    %c0_18 = arith.constant 0 : index
    %c0_19 = arith.constant 0 : index
    %36 = vector.load %arg8[%c0_18, %c0_19] : memref<256x256xbf16, #tpu.memory_space<vmem>>, vector<256x256xbf16>
    %cst_20 = arith.constant dense<0.000000e+00> : vector<8x256xf32>
    %37 = tpu.matmul %35, %36, %cst_20 {dimension_numbers = #tpu.dot_dimension_numbers<[1], [0], [0], [1], [0, 0, 1, 1], [], []>} : vector<8x256xbf16>, vector<256x256xbf16>, vector<8x256xf32> -> vector<8x256xf32>
    %c0_21 = arith.constant 0 : index
    %c0_22 = arith.constant 0 : index
    %38 = vector.load %arg9[%c0_21, %c0_22] : memref<1x256xf32, #tpu.memory_space<vmem>>, vector<1x256xf32>
    %39 = vector.broadcast %38 : vector<1x256xf32> to vector<8x256xf32>
    %40 = arith.addf %37, %39 : vector<8x256xf32>
    %41 = arith.negf %40 : vector<8x256xf32>
    %42 = math.exp %41 : vector<8x256xf32>
    %cst_23 = arith.constant 1.000000e+00 : f32
    %43 = vector.broadcast %cst_23 : f32 to vector<8x256xf32>
    %44 = arith.addf %43, %42 : vector<8x256xf32>
    %45 = arith.divf %43, %44 : vector<8x256xf32>
    %c0_24 = arith.constant 0 : index
    %c0_25 = arith.constant 0 : index
    %46 = vector.load %arg10[%c0_24, %c0_25] : memref<8x256xf32, #tpu.memory_space<vmem>>, vector<8x256xf32>
    tpu.vector_store %arg10[%c0_24, %c0_25], %45 {strides = array<i32>} : memref<8x256xf32, #tpu.memory_space<vmem>>, vector<8x256xf32>,
    return
  }
  func.func @transform_0(%arg0: i32) -> (i32, i32) {
    %c0_i32 = arith.constant 0 : i32
    %c0_i32_0 = arith.constant 0 : i32
    return %arg0, %c0_i32 : i32, i32
  }
  func.func @transform_1(%arg0: i32) -> (i32, i32) {
    %c0_i32 = arith.constant 0 : i32
    %c0_i32_0 = arith.constant 0 : i32
    %c0_i32_1 = arith.constant 0 : i32
    return %c0_i32, %c0_i32_0 : i32, i32
  }
  func.func @transform_2(%arg0: i32) -> (i32, i32) {
    %c0_i32 = arith.constant 0 : i32
    %c0_i32_0 = arith.constant 0 : i32
    %c0_i32_1 = arith.constant 0 : i32
    return %c0_i32, %c0_i32_0 : i32, i32
  }
  func.func @transform_3(%arg0: i32) -> (i32, i32) {
    %c0_i32 = arith.constant 0 : i32
    %c0_i32_0 = arith.constant 0 : i32
    %c0_i32_1 = arith.constant 0 : i32
    return %c0_i32, %c0_i32_0 : i32, i32
  }
  func.func @transform_4(%arg0: i32) -> (i32, i32) {
    %c0_i32 = arith.constant 0 : i32
    %c0_i32_0 = arith.constant 0 : i32
    %c0_i32_1 = arith.constant 0 : i32
    return %c0_i32, %c0_i32_0 : i32, i32
  }
  func.func @transform_5(%arg0: i32) -> (i32, i32) {
    %c0_i32 = arith.constant 0 : i32
    %c0_i32_0 = arith.constant 0 : i32
    %c0_i32_1 = arith.constant 0 : i32
    return %c0_i32, %c0_i32_0 : i32, i32
  }
  func.func @transform_6(%arg0: i32) -> (i32, i32) {
    %c0_i32 = arith.constant 0 : i32
    %c0_i32_0 = arith.constant 0 : i32
    %c0_i32_1 = arith.constant 0 : i32
    return %c0_i32, %c0_i32_0 : i32, i32
  }
  func.func @transform_7(%arg0: i32) -> (i32, i32) {
    %c0_i32 = arith.constant 0 : i32
    %c0_i32_0 = arith.constant 0 : i32
    %c0_i32_1 = arith.constant 0 : i32
    return %c0_i32, %c0_i32_0 : i32, i32
  }
  func.func @transform_8(%arg0: i32) -> (i32, i32) {
    %c0_i32 = arith.constant 0 : i32
    %c0_i32_0 = arith.constant 0 : i32
    %c0_i32_1 = arith.constant 0 : i32
    return %c0_i32, %c0_i32_0 : i32, i32
  }
  func.func @transform_9(%arg0: i32) -> (i32, i32) {
    %c0_i32 = arith.constant 0 : i32
    %c0_i32_0 = arith.constant 0 : i32
    return %arg0, %c0_i32 : i32, i32
  }
}

</mosaic_0001>

<bundles_post_ra>
// kernel: generative_model_forward.1
= control target key start
LH: loop header
LB: loop body
LE: loop exit
PB: predicated region body
PF: predicated region fallthrough
CT: control target
= control target key end

     0   :  { %14 = vsyncpa [#allocation3], 0  ;;  %s1925_s0 = inlined_call_operand.vmem [shape: f32[16,2], index: 0, kind: input, shape index: {}]   ;;  %s1926_s1 = inlined_call_operand.vmem [shape: f32[2,256], index: 1, kind: input, shape index: {}]   ;;  %s1927_s2 = inlined_call_operand.vmem [shape: f32[1,256], index: 2, kind: input, shape index: {}]   ;;  %s1928_s3 = inlined_call_operand.hbm [shape: bf16[256,256], index: 3, kind: input, shape index: {}]   ;;  %s1929_s4 = inlined_call_operand.vmem [shape: f32[1,256], index: 4, kind: input, shape index: {}]   ;;  %s1930_s5 = inlined_call_operand.hbm [shape: bf16[256,256], index: 5, kind: input, shape index: {}]   ;;  %s1931_s6 = inlined_call_operand.vmem [shape: f32[1,256], index: 6, kind: input, shape index: {}]   ;;  %s1932_s7 = inlined_call_operand.hbm [shape: bf16[256,256], index: 7, kind: input, shape index: {}]   ;;  %s1933_s8 = inlined_call_operand.vmem [shape: f32[1,256], index: 8, kind: input, shape index: {}]   ;;  %s1934_s9 = inlined_call_operand.vmem [shape: f32[16,256], index: 9, kind: output, shape index: {}]  }
   0x1   :  { %15 = vsyncpa [#allocation5], 0  ;;  %s1750_s30 = smov 0  }
   0x2 LB: > { %s1756_s10 = sadd.s32 4294967295, %s1691_s30   ;;  %p1282_p0 = scmp.ge.s32.totalorder %s1691_s30, 1  ;;  %s1691_s30 = sphi %s1750_s30, %s21_s30  }
   0x3   : > { %p246_p1 = scmp.lt.s32.totalorder %s1691_s30, 3  ;;  %p1935_p2 = scmp.eq.s32.totalorder %s1756_s10, 0 }
   0x4   : > { %s1693_s12 = smov [#allocation4]   ;;  %s1694_s14 = smov [#allocation2]  }
   0x5   : > { %p1761_p3 = pnand %p1282_p0, %p246_p1  ;;  %s280_s13 = sshll.u32 %s1693_s12, 4  ;;  %s281_s13 = int_to_ptr.vmem [resolvable:$true] %s280_s13 }
   0x6   : > { %s264_s15 = sshll.u32 %s1694_s14, 4  ;;  %s1695_s17 = smov [#allocation6]   ;;  %s1773_s15 = int_to_ptr.vmem [resolvable:$true] %s264_s15 }
   0x7   : > { %s1937_s11 = scalar_select %p1761_p3, 1, 0 }
   0x8   : > { %p1408_p4 = pneg %p1761_p3  ;;  %s296_s18 = sshll.u32 %s1695_s17, 4  ;;  %s1775_s18 = int_to_ptr.vmem [resolvable:$true] %s296_s18 }
   0x9   : > { %s1593_s21 = scalar_lea.hbm %s1930_s5, 4096 }
   0xa   : > { %p1769_p5 = pnand %p1935_p2, %p1408_p4  ;;  %p1594_p6 = scmp.ne.s32.totalorder %s1930_s5, %s1593_s21 }
   0xb   : > { %p1600_p10 = scmp.lt.u32.totalorder %s1593_s21, %s1930_s5 }
   0xc   : > { %p1785_p7 = pneg %p1769_p5 }
   0xe   : > { %p1596_p8 = pnand %p1785_p7, %p1594_p6 }
  0x10   : > { %p1597_p9 = pneg %p1596_p8 }
  0x12   : > { %p1602_p11 = pnand %p1600_p10, %p1597_p9 }
  0x14   : > { %1605 = shalt.err (!%p1602_p11)
}
  0x15   : > { %s1606_s27 = scalar_lea.vmem %s281_s13, 4096  ;;  %p1614_p1 = scmp.lt.s32.totalorder %s281_s13, %s281_s13 }
  0x16   : > { %p1607_p12 = scmp.ne.s32.totalorder %s281_s13, %s1606_s27  ;;  %p1615_p4 = scmp.lt.s32.totalorder %s1606_s27, %s1606_s27 }
  0x18   : > { %p1609_p13 = pnand %p1607_p12, %p1785_p7  ;;  %p1616_p2 = por %p1615_p4, %p1614_p1 }
  0x1a   : > { %p1610_p0 = pneg %p1609_p13 }
  0x1c   : > { %p1617_p3 = pnand %p1616_p2, %p1610_p0 }
  0x1e   : > { %1620 = shalt.err (!%p1617_p3)
}
  0x1f   : > { %s1696_s28 = smov 128   ;;  %s1697_s29 = smov 8  }
  0x20   : > { %1414 = dma.hbm_to_vmem [thread:$0]  (!%p1769_p5), %s1930_s5, 4096, %s281_s13, [#allocation5], %s1696_s28, %s1696_s28, %s1697_s29  }
  0x21   : > { %s1621_s20 = scalar_lea.hbm %s1928_s3, 4096 }
  0x22   : > { %p1622_p2 = scmp.ne.s32.totalorder %s1928_s3, %s1621_s20  ;;  %p1628_p8 = scmp.lt.u32.totalorder %s1621_s20, %s1928_s3 }
  0x24   : > { %p1624_p3 = pnand %p1622_p2, %p1785_p7 }
  0x26   : > { %p1625_p6 = pneg %p1624_p3 }
  0x28   : > { %p1630_p9 = pnand %p1628_p8, %p1625_p6 }
  0x2a   : > { %1633 = shalt.err (!%p1630_p9)
}
  0x2b   : > { %s1634_s13 = scalar_lea.vmem %s1773_s15, 4096  ;;  %p1642_p13 = scmp.lt.s32.totalorder %s1773_s15, %s1773_s15 }
  0x2c   : > { %p1635_p10 = scmp.ne.s32.totalorder %s1773_s15, %s1634_s13  ;;  %p1643_p0 = scmp.lt.s32.totalorder %s1634_s13, %s1634_s13 }
  0x2e   : > { %p1637_p11 = pnand %p1635_p10, %p1785_p7  ;;  %p1644_p1 = por %p1643_p0, %p1642_p13 }
  0x30   : > { %p1638_p12 = pneg %p1637_p11 }
  0x32   : > { %p1645_p4 = pnand %p1644_p1, %p1638_p12 }
  0x34   : > { %1648 = shalt.err (!%p1645_p4)
}
  0x35   : > { %1411 = dma.hbm_to_vmem [thread:$0]  (!%p1769_p5), %s1928_s3, 4096, %s1773_s15, [#allocation3], %s1696_s28, %s1696_s28, %s1697_s29  }
  0x36   : > { %s1649_s17 = scalar_lea.hbm %s1932_s7, 4096 }
  0x37   : > { %p1650_p2 = scmp.ne.s32.totalorder %s1932_s7, %s1649_s17  ;;  %p1656_p8 = scmp.lt.u32.totalorder %s1649_s17, %s1932_s7 }
  0x39   : > { %p1652_p3 = pnand %p1650_p2, %p1785_p7 }
  0x3b   : > { %p1653_p6 = pneg %p1652_p3 }
  0x3d   : > { %p1658_p9 = pnand %p1656_p8, %p1653_p6 }
  0x3f   : > { %1661 = shalt.err (!%p1658_p9)
}
  0x40   : > { %s1662_s15 = scalar_lea.vmem %s1775_s18, 4096  ;;  %p1670_p13 = scmp.lt.s32.totalorder %s1775_s18, %s1775_s18 }
  0x41   : > { %p1663_p10 = scmp.ne.s32.totalorder %s1775_s18, %s1662_s15  ;;  %p1671_p0 = scmp.lt.s32.totalorder %s1662_s15, %s1662_s15 }
  0x43   : > { %p1665_p11 = pnand %p1663_p10, %p1785_p7  ;;  %p1672_p1 = por %p1671_p0, %p1670_p13 }
  0x45   : > { %p1666_p12 = pneg %p1665_p11 }
  0x47   : > { %p1673_p4 = pnand %p1672_p1, %p1666_p12 }
  0x49   : > { %1676 = shalt.err (!%p1673_p4)
}
  0x4a   : > { %1417 = dma.hbm_to_vmem [thread:$0]  (!%p1769_p5), %s1932_s7, 4096, %s1775_s18, [#allocation5], %s1696_s28, %s1696_s28, %s1697_s29  }
  0x4b   : > { %p1940_p2 = scmp.ne.s32.totalorder %s1937_s11, 0 }
  0x4c   : > { %p1941_p7 = scmp.eq.s32.totalorder (!%p1940_p2), %s1756_s10, 0 }
  0x4d   : > { %322 = sbr.rel (%p1940_p2) target bundleno = 925 (0x39d), region = 56 }
  0x54   : > { %1682 = dma.done.wait (%p1941_p7), [#allocation3], 4096   ;;  %p1942_p3 = pmov %p1941_p7 }
  0x56   : > { %1684 = vsyncadd (%p1942_p3), [#allocation3], 4294963200  ;;  %p1943_p6 = pmov %p1942_p3 }
  0x57   : > { %p1944_p8 = pmov %p1942_p3 }
  0x58   : > { %1686 = dma.done.wait (%p1943_p6), [#allocation5], 8192  }
  0x59   : > { %1688 = vsyncadd (%p1944_p8), [#allocation5], 4294959104  ;;  %p365_p9 = scmp.lt.s32.totalorder %s1756_s10, 1  ;;  %v1698_v0 = vmov 0   ;;  %v1441_v2 = vld [vmem:[#allocation2 + $0x4] ss:$8 sps:$4 sm:$0xff]   ;;  %v382_v62 = vlaneseq }
  0x5a   : > { %1439 = vset.pattern.permute.xlu0 %v1698_v0  ;;  %v1443_v3 = vld [vmem:[#allocation2] ss:$8 sps:$4 sm:$0xff]   ;;  %v1444_v4 = vld [vmem:[#allocation2 + $0x14] ss:$8 sps:$4 sm:$0xff]   ;;  %637 = vmatprep.subr.bf16.mxu0 %v1441_v2  ;;  %v1446_v5 = vld [vmem:[#allocation2 + $0x10] ss:$8 sps:$4 sm:$0xff]  }
  0x5b   : > { %s1946_s10 = smov (!%p365_p9, %s1756_s10), 1  ;;  %638 = vmatpush1.bf16.msra.mxu0 %v1443_v3  ;;  %v1699_v6 = vmov 1   ;;  %v1447_v7 = vld [vmem:[#allocation2 + $0x24] ss:$8 sps:$4 sm:$0xff]   ;;  %v1449_v8 = vld [vmem:[#allocation2 + $0x20] ss:$8 sps:$4 sm:$0xff]  }
  0x5c   : > { %s1291_s11 = sshll.u32 %s1946_s10, 3  ;;  %639 = vmatprep.subr.bf16.mxu0 %v1444_v4  ;;  %v1450_v9 = vld [vmem:[#allocation2 + $0x34] ss:$8 sps:$4 sm:$0xff]   ;;  %v1452_v10 = vld [vmem:[#allocation2 + $0x30] ss:$8 sps:$4 sm:$0xff]   ;;  %v383_v63 = vshrl.u32 %v382_v62, 7 }
  0x5d   : > { %s368_s24 = scalar_lea.vmem %s1925_s0, %s1291_s11  ;;  %v1453_v11 = vld [vmem:[#allocation2 + $0x44] ss:$8 sps:$4 sm:$0xff]   ;;  %v1455_v12 = vld [vmem:[#allocation2 + $0x40] ss:$8 sps:$4 sm:$0xff]   ;;  %v1456_v13 = vld [vmem:[#allocation2 + $0x54] ss:$8 sps:$4 sm:$0xff]  }
  0x5e   : > { %v374_v1 = vld [vmem:[%s368_s24] sm:$0xff]  ;;  %v1458_v14 = vld [vmem:[#allocation2 + $0x50] ss:$8 sps:$4 sm:$0xff]   ;;  %v1492_v19 = vld [vmem:[#allocation4 + $0x14] ss:$8 sps:$4 sm:$0xff]   ;;  %v1874_v0 = vsub.s32 0, %v383_v63 }
  0x5f   : > { %378 = vperm.xlu0 %1439, %v374_v1   ;;  %640 = vmatpush1.bf16.msra.mxu0 %v1446_v5  ;;  %v1459_v15 = vld [vmem:[#allocation2 + $0x64] ss:$8 sps:$4 sm:$0xff]   ;;  %v1461_v16 = vld [vmem:[#allocation2 + $0x60] ss:$8 sps:$4 sm:$0xff]   ;;  %v1462_v20 = vld [vmem:[#allocation2 + $0x74] ss:$8 sps:$4 sm:$0xff]  }
  0x60   : > { %641 = vmatprep.subr.bf16.mxu0 %v1447_v7  ;;  %v1489_v17 = vld [vmem:[#allocation4 + $0x4] ss:$8 sps:$4 sm:$0xff]   ;;  %v1491_v18 = vld [vmem:[#allocation4] ss:$8 sps:$4 sm:$0xff]   ;;  %v1494_v21 = vld [vmem:[#allocation4 + $0x10] ss:$8 sps:$4 sm:$0xff]  }
  0x61   : > { %888 = vmatprep.subr.bf16.mxu1 %v1489_v17  ;;  %v1495_v22 = vld [vmem:[#allocation4 + $0x24] ss:$8 sps:$4 sm:$0xff]   ;;  %v1464_v23 = vld [vmem:[#allocation2 + $0x70] ss:$8 sps:$4 sm:$0xff]   ;;  %v1497_v25 = vld [vmem:[#allocation4 + $0x20] ss:$8 sps:$4 sm:$0xff]  }
  0x62   : > { %889 = vmatpush1.bf16.msra.mxu1 %v1491_v18  ;;  %v1465_v24 = vld [vmem:[#allocation2 + $0x84] ss:$8 sps:$4 sm:$0xff]   ;;  %v1498_v26 = vld [vmem:[#allocation4 + $0x34] ss:$8 sps:$4 sm:$0xff]   ;;  %v1467_v27 = vld [vmem:[#allocation2 + $0x80] ss:$8 sps:$4 sm:$0xff]  }
  0x63   : > { %1440 = vset.pattern.permute.xlu0 %v1699_v6  ;;  %642 = vmatpush1.bf16.msra.mxu0 %v1449_v8  ;;  %v1468_v28 = vld [vmem:[#allocation2 + $0x94] ss:$8 sps:$4 sm:$0xff]   ;;  %v1500_v29 = vld [vmem:[#allocation4 + $0x30] ss:$8 sps:$4 sm:$0xff]   ;;  %v1501_v30 = vld [vmem:[#allocation4 + $0x44] ss:$8 sps:$4 sm:$0xff]  }
  0x64   : > { %397 = vperm.xlu0 %1440, %v374_v1   ;;  %643 = vmatprep.subr.bf16.mxu0 %v1450_v9  ;;  %v1470_v31 = vld [vmem:[#allocation2 + $0x90] ss:$8 sps:$4 sm:$0xff]   ;;  %v1471_v32 = vld [vmem:[#allocation2 + $0xa4] ss:$8 sps:$4 sm:$0xff]   ;;  %v1473_v33 = vld [vmem:[#allocation2 + $0xa0] ss:$8 sps:$4 sm:$0xff]  }
  0x65   : > { %890 = vmatprep.subr.bf16.mxu1 %v1492_v19  ;;  %v1503_v34 = vld [vmem:[#allocation4 + $0x40] ss:$8 sps:$4 sm:$0xff]   ;;  %v1474_v35 = vld [vmem:[#allocation2 + $0xb4] ss:$8 sps:$4 sm:$0xff]   ;;  %v1506_v37 = vld [vmem:[#allocation4 + $0x50] ss:$8 sps:$4 sm:$0xff]  }
  0x66   : > { %891 = vmatpush1.bf16.msra.mxu1 %v1494_v21  ;;  %v1504_v36 = vld [vmem:[#allocation4 + $0x54] ss:$8 sps:$4 sm:$0xff]   ;;  %v1507_v38 = vld [vmem:[#allocation4 + $0x64] ss:$8 sps:$4 sm:$0xff]   ;;  %v1476_v39 = vld [vmem:[#allocation2 + $0xb0] ss:$8 sps:$4 sm:$0xff]  }
  0x67   : > { %644 = vmatpush1.bf16.msra.mxu0 %v1452_v10  ;;  %892 = vmatprep.subr.bf16.mxu1 %v1495_v22  ;;  %v1477_v40 = vld [vmem:[#allocation2 + $0xc4] ss:$8 sps:$4 sm:$0xff]   ;;  %v1509_v41 = vld [vmem:[#allocation4 + $0x60] ss:$8 sps:$4 sm:$0xff]   ;;  %v1510_v42 = vld [vmem:[#allocation4 + $0x74] ss:$8 sps:$4 sm:$0xff]  }
  0x68   : > { %645 = vmatprep.subr.bf16.mxu0 %v1453_v11  ;;  %v1479_v43 = vld [vmem:[#allocation2 + $0xc0] ss:$8 sps:$4 sm:$0xff]   ;;  %v1480_v44 = vld [vmem:[#allocation2 + $0xd4] ss:$8 sps:$4 sm:$0xff]   ;;  %v1512_v45 = vld [vmem:[#allocation4 + $0x70] ss:$8 sps:$4 sm:$0xff]  }
  0x69   : > { %v1513_v46 = vld [vmem:[#allocation4 + $0x84] ss:$8 sps:$4 sm:$0xff]   ;;  %v1482_v47 = vld [vmem:[#allocation2 + $0xd0] ss:$8 sps:$4 sm:$0xff]   ;;  %v1515_v49 = vld [vmem:[#allocation4 + $0x80] ss:$8 sps:$4 sm:$0xff]  }
  0x6a   : > { %893 = vmatpush1.bf16.msra.mxu1 %v1497_v25  ;;  %v1483_v48 = vld [vmem:[#allocation2 + $0xe4] ss:$8 sps:$4 sm:$0xff]   ;;  %v1516_v50 = vld [vmem:[#allocation4 + $0x94] ss:$8 sps:$4 sm:$0xff]   ;;  %v1485_v51 = vld [vmem:[#allocation2 + $0xe0] ss:$8 sps:$4 sm:$0xff]  }
  0x6b   : > { %646 = vmatpush1.bf16.msra.mxu0 %v1455_v12  ;;  %894 = vmatprep.subr.bf16.mxu1 %v1498_v26  ;;  %v1486_v52 = vld [vmem:[#allocation2 + $0xf4] ss:$8 sps:$4 sm:$0xff]   ;;  %v1518_v53 = vld [vmem:[#allocation4 + $0x90] ss:$8 sps:$4 sm:$0xff]   ;;  %v1519_v54 = vld [vmem:[#allocation4 + $0xa4] ss:$8 sps:$4 sm:$0xff]  }
  0x6c   : > { %647 = vmatprep.subr.bf16.mxu0 %v1456_v13  ;;  %v1488_v55 = vld [vmem:[#allocation2 + $0xf0] ss:$8 sps:$4 sm:$0xff]   ;;  %v1521_v56 = vld [vmem:[#allocation4 + $0xa0] ss:$8 sps:$4 sm:$0xff]   ;;  %v1522_v57 = vld [vmem:[#allocation4 + $0xb4] ss:$8 sps:$4 sm:$0xff]  }
  0x6d   : > { %v1524_v58 = vld [vmem:[#allocation4 + $0xb0] ss:$8 sps:$4 sm:$0xff]   ;;  %v1525_v59 = vld [vmem:[#allocation4 + $0xc4] ss:$8 sps:$4 sm:$0xff]   ;;  %v1527_v60 = vld [vmem:[#allocation4 + $0xc0] ss:$8 sps:$4 sm:$0xff]  }
  0x6e   : > { %895 = vmatpush1.bf16.msra.mxu1 %v1500_v29  ;;  %v1528_v61 = vld [vmem:[#allocation4 + $0xd4] ss:$8 sps:$4 sm:$0xff]   ;;  %v1876_v1 = vsub.s32 1, %v383_v63  ;;  %v375_v2 = vld [vmem:[%s1926_s1] ss:$2 sm:$0x3] }
  0x6f   : > { %648 = vmatpush1.bf16.msra.mxu0 %v1458_v14  ;;  %896 = vmatprep.subr.bf16.mxu1 %v1501_v30  ;;  %v1294_v3 = vld [vmem:[%s1926_s1 + $0x1] ss:$2 sm:$0x3]  ;;  %v385_v5 = vrot.slane %v375_v2, %v1874_v0  ;;  %v1530_v25 = vld [vmem:[#allocation4 + $0xd0] ss:$8 sps:$4 sm:$0xff]   ;;  %s1395_s15 = sshll.u32 %s1946_s10, 4 }
  0x70   : > { %649 = vmatprep.subr.bf16.mxu0 %v1459_v15  ;;  %v389_v6 = vrot.slane %v375_v2, %v1876_v1  ;;  %v404_v7 = vrot.slane %v1294_v3, %v1874_v0  ;;  %v408_v8 = vrot.slane %v1294_v3, %v1876_v1  ;;  %v415_v9 = vld [vmem:[%s1927_s2] sm:$0x3]  ;;  %v1531_v26 = vld [vmem:[#allocation4 + $0xe4] ss:$8 sps:$4 sm:$0xff]   ;;  %v1536_v29 = vld [vmem:[#allocation4 + $0xf0] ss:$8 sps:$4 sm:$0xff]   ;;  %s373_s11 = scalar_lea.vmem %s1934_s9, %s1395_s15 }
  0x71   : > { %v420_v10 = vrot.slane %v415_v9, %v1874_v0  ;;  %v424_v12 = vrot.slane %v415_v9, %v1876_v1  ;;  %v1537_v30 = vld [vmem:[#allocation6] ss:$8 sps:$4 sm:$0xff]  }
  0x72   : > { %897 = vmatpush1.bf16.msra.mxu1 %v1503_v34  ;;  %v1545_v34 = vld [vmem:[#allocation6 + $0x24] ss:$8 sps:$4 sm:$0xff]  }
  0x73   : > { %650 = vmatpush1.bf16.msra.mxu0 %v1461_v16  ;;  %898 = vmatprep.subr.bf16.mxu1 %v1504_v36  ;;  %v1548_v36 = vld [vmem:[#allocation6 + $0x34] ss:$8 sps:$4 sm:$0xff]  }
  0x74   : > { %651 = vmatprep.subr.bf16.mxu0 %v1462_v20 }
  0x76   : > { %899 = vmatpush1.bf16.msra.mxu1 %v1506_v37  ;;  %v1546_v37 = vld [vmem:[#allocation6 + $0x30] ss:$8 sps:$4 sm:$0xff]  }
  0x77   : > { %652 = vmatpush1.bf16.msra.mxu0 %v1464_v23  ;;  %900 = vmatprep.subr.bf16.mxu1 %v1507_v38  ;;  %v1551_v38 = vld [vmem:[#allocation6 + $0x44] ss:$8 sps:$4 sm:$0xff]  }
  0x78   : > { %653 = vmatprep.subr.bf16.mxu0 %v1465_v24 }
  0x7a   : > { %901 = vmatpush1.bf16.msra.mxu1 %v1509_v41  ;;  %v1552_v41 = vld [vmem:[#allocation6 + $0x50] ss:$8 sps:$4 sm:$0xff]  }
  0x7b   : > { %654 = vmatpush1.bf16.msra.mxu0 %v1467_v27  ;;  %902 = vmatprep.subr.bf16.mxu1 %v1510_v42  ;;  %v1533_v27 = vld [vmem:[#allocation4 + $0xe0] ss:$8 sps:$4 sm:$0xff]   ;;  %v1557_v42 = vld [vmem:[#allocation6 + $0x64] ss:$8 sps:$4 sm:$0xff]  }
  0x7c   : > { %655 = vmatprep.subr.bf16.mxu0 %v1468_v28  ;;  %v1534_v28 = vld [vmem:[#allocation4 + $0xf4] ss:$8 sps:$4 sm:$0xff]  }
  0x7e   : > { %903 = vmatpush1.bf16.msra.mxu1 %v1512_v45  ;;  %v1558_v45 = vld [vmem:[#allocation6 + $0x70] ss:$8 sps:$4 sm:$0xff]  }
  0x7f   : > { %656 = vmatpush1.bf16.msra.mxu0 %v1470_v31  ;;  %904 = vmatprep.subr.bf16.mxu1 %v1513_v46  ;;  %v1539_v31 = vld [vmem:[#allocation6 + $0x4] ss:$8 sps:$4 sm:$0xff]  }
  0x80   : > { %657 = vmatprep.subr.bf16.mxu0 %v1471_v32  ;;  %v1542_v32 = vld [vmem:[#allocation6 + $0x14] ss:$8 sps:$4 sm:$0xff]   ;;  %v1563_v46 = vld [vmem:[#allocation6 + $0x84] ss:$8 sps:$4 sm:$0xff]  }
  0x82   : > { %905 = vmatpush1.bf16.msra.mxu1 %v1515_v49  ;;  %v1564_v49 = vld [vmem:[#allocation6 + $0x90] ss:$8 sps:$4 sm:$0xff]  }
  0x83   : > { %658 = vmatpush1.bf16.msra.mxu0 %v1473_v33  ;;  %906 = vmatprep.subr.bf16.mxu1 %v1516_v50  ;;  %v1540_v33 = vld [vmem:[#allocation6 + $0x10] ss:$8 sps:$4 sm:$0xff]   ;;  %v1569_v50 = vld [vmem:[#allocation6 + $0xa4] ss:$8 sps:$4 sm:$0xff]  }
  0x84   : > { %659 = vmatprep.subr.bf16.mxu0 %v1474_v35  ;;  %v1543_v35 = vld [vmem:[#allocation6 + $0x20] ss:$8 sps:$4 sm:$0xff]  }
  0x86   : > { %907 = vmatpush1.bf16.msra.mxu1 %v1518_v53  ;;  %v1570_v53 = vld [vmem:[#allocation6 + $0xb0] ss:$8 sps:$4 sm:$0xff]  }
  0x87   : > { %660 = vmatpush1.bf16.msra.mxu0 %v1476_v39  ;;  %908 = vmatprep.subr.bf16.mxu1 %v1519_v54  ;;  %v1549_v39 = vld [vmem:[#allocation6 + $0x40] ss:$8 sps:$4 sm:$0xff]   ;;  %v1575_v54 = vld [vmem:[#allocation6 + $0xc4] ss:$8 sps:$4 sm:$0xff]  }
  0x88   : > { %661 = vmatprep.subr.bf16.mxu0 %v1477_v40  ;;  %v1554_v40 = vld [vmem:[#allocation6 + $0x54] ss:$8 sps:$4 sm:$0xff]  }
  0x8a   : > { %909 = vmatpush1.bf16.msra.mxu1 %v1521_v56  ;;  %v1578_v56 = vld [vmem:[#allocation6 + $0xd4] ss:$8 sps:$4 sm:$0xff]  }
  0x8b   : > { %662 = vmatpush1.bf16.msra.mxu0 %v1479_v43  ;;  %910 = vmatprep.subr.bf16.mxu1 %v1522_v57  ;;  %v1555_v43 = vld [vmem:[#allocation6 + $0x60] ss:$8 sps:$4 sm:$0xff]   ;;  %v1576_v57 = vld [vmem:[#allocation6 + $0xd0] ss:$8 sps:$4 sm:$0xff]  }
  0x8c   : > { %663 = vmatprep.subr.bf16.mxu0 %v1480_v44  ;;  %v1560_v44 = vld [vmem:[#allocation6 + $0x74] ss:$8 sps:$4 sm:$0xff]  }
  0x8e   : > { %911 = vmatpush1.bf16.msra.mxu1 %v1524_v58  ;;  %v465_v58 = vld [vmem:[%s1929_s4] sm:$0x3] }
  0x8f   : > { %664 = vmatpush1.bf16.msra.mxu0 %v1482_v47  ;;  %912 = vmatprep.subr.bf16.mxu1 %v1525_v59  ;;  %v1561_v47 = vld [vmem:[#allocation6 + $0x80] ss:$8 sps:$4 sm:$0xff]   ;;  %v470_v59 = vrot.slane %v465_v58, %v1874_v0 }
  0x90   : > { %665 = vmatprep.subr.bf16.mxu0 %v1483_v48  ;;  %v1566_v48 = vld [vmem:[#allocation6 + $0x94] ss:$8 sps:$4 sm:$0xff]  }
  0x92   : > { %913 = vmatpush1.bf16.msra.mxu1 %v1527_v60  ;;  %v474_v60 = vrot.slane %v465_v58, %v1876_v1 }
  0x93   : > { %666 = vmatpush1.bf16.msra.mxu0 %v1485_v51  ;;  %914 = vmatprep.subr.bf16.mxu1 %v1528_v61  ;;  %v1567_v51 = vld [vmem:[#allocation6 + $0xa0] ss:$8 sps:$4 sm:$0xff]  }
  0x94   : > { %667 = vmatprep.subr.bf16.mxu0 %v1486_v52  ;;  %v1572_v52 = vld [vmem:[#allocation6 + $0xb4] ss:$8 sps:$4 sm:$0xff]  }
  0x96   : > { %915 = vmatpush1.bf16.msra.mxu1 %v1530_v25 }
  0x97   : > { %668 = vmatpush1.bf16.msra.mxu0 %v1488_v55  ;;  %916 = vmatprep.subr.bf16.mxu1 %v1531_v26  ;;  %v1573_v55 = vld [vmem:[#allocation6 + $0xc0] ss:$8 sps:$4 sm:$0xff]  }
  0x98   : > { %1139 = vmatprep.subr.bf16.mxu0 %v1539_v31 }
  0x9a   : > { %917 = vmatpush1.bf16.msra.mxu1 %v1533_v27 }
  0x9b   : > { %918 = vmatprep.subr.bf16.mxu1 %v1534_v28 }
  0x9e   : > { %919 = vmatpush1.bf16.msra.mxu1 %v1536_v29 }
  0xde   : > { %v379_v4 = vpop.permute.xlu0 %378 }
  0xdf   : > { %v392_v13 = vmul.f32 %v385_v5, %v379_v4  ;;  %v393_v14 = vmul.f32 %v389_v6, %v379_v4 }
  0xe3   : > { %v398_v11 = vpop.permute.xlu0 %397 }
  0xe4   : > { %v411_v15 = vmul.f32 %v404_v7, %v398_v11  ;;  %v412_v16 = vmul.f32 %v408_v8, %v398_v11  ;;  %v1581_v11 = vld [vmem:[#allocation6 + $0xe4] ss:$8 sps:$4 sm:$0xff]  }
  0xe6   : > { %v413_v17 = vadd.f32 %v411_v15, %v392_v13  ;;  %v414_v18 = vadd.f32 %v412_v16, %v393_v14  ;;  %v1584_v13 = vld [vmem:[#allocation6 + $0xf4] ss:$8 sps:$4 sm:$0xff]   ;;  %v1582_v14 = vld [vmem:[#allocation6 + $0xf0] ss:$8 sps:$4 sm:$0xff]   ;;  %v716_v15 = vld [vmem:[%s1931_s6] sm:$0x3] }
  0xe7   : > { %v721_v16 = vrot.slane %v716_v15, %v1874_v0 }
  0xe8   : > { %v427_v19 = vadd.f32 %v420_v10, %v413_v17  ;;  %v428_v20 = vadd.f32 %v424_v12, %v414_v18  ;;  %v1579_v12 = vld [vmem:[#allocation6 + $0xe0] ss:$8 sps:$4 sm:$0xff]   ;;  %v725_v17 = vrot.slane %v716_v15, %v1876_v1 }
  0xea   : > { %v1893_v21 = vmax.f32 %v427_v19, 0.0  ;;  %v1895_v22 = vmax.f32 %v428_v20, 0.0 }
  0xec   : > { %v432_v23 = vpack.c.bf16 %v1895_v22, %v1895_v22  ;;  %v431_v24 = vpack.c.bf16 %v1893_v21, %v1893_v21 }
  0xee   : > { %669 = vmatprep.mubr.bf16.mxu0 %v432_v23 }
  0xef   : > { %670 = vmatmul.mubr.bf16.vlgmr.msra.gmra.mrb[0].mxu0 %v431_v24 }
  0xf0   : > { %1140 = vmatpush1.bf16.msra.mxu0 %v1537_v30  ;;  %v967_v30 = vld [vmem:[%s1933_s8] sm:$0x3] }
  0xf1   : > { %1141 = vmatprep.subr.bf16.mxu0 %v1542_v32  ;;  %v972_v31 = vrot.slane %v967_v30, %v1874_v0  ;;  %v976_v32 = vrot.slane %v967_v30, %v1876_v1 }
  0xf4   : > { %1142 = vmatpush1.bf16.msra.mxu0 %v1540_v33 }
  0xf5   : > { %1143 = vmatprep.subr.bf16.mxu0 %v1545_v34 }
  0xf8   : > { %1144 = vmatpush1.bf16.msra.mxu0 %v1543_v35 }
  0xf9   : > { %1145 = vmatprep.subr.bf16.mxu0 %v1548_v36 }
  0xfc   : > { %1146 = vmatpush1.bf16.msra.mxu0 %v1546_v37 }
  0xfd   : > { %1147 = vmatprep.subr.bf16.mxu0 %v1551_v38 }
 0x100   : > { %1148 = vmatpush1.bf16.msra.mxu0 %v1549_v39 }
 0x101   : > { %1149 = vmatprep.subr.bf16.mxu0 %v1554_v40 }
 0x104   : > { %1150 = vmatpush1.bf16.msra.mxu0 %v1552_v41 }
 0x105   : > { %1151 = vmatprep.subr.bf16.mxu0 %v1557_v42 }
 0x108   : > { %1152 = vmatpush1.bf16.msra.mxu0 %v1555_v43 }
 0x109   : > { %1153 = vmatprep.subr.bf16.mxu0 %v1560_v44 }
 0x10c   : > { %1154 = vmatpush1.bf16.msra.mxu0 %v1558_v45 }
 0x10d   : > { %1155 = vmatprep.subr.bf16.mxu0 %v1563_v46 }
 0x110   : > { %1156 = vmatpush1.bf16.msra.mxu0 %v1561_v47 }
 0x111   : > { %1157 = vmatprep.subr.bf16.mxu0 %v1566_v48 }
 0x114   : > { %1158 = vmatpush1.bf16.msra.mxu0 %v1564_v49 }
 0x115   : > { %1159 = vmatprep.subr.bf16.mxu0 %v1569_v50 }
 0x118   : > { %1160 = vmatpush1.bf16.msra.mxu0 %v1567_v51 }
 0x119   : > { %1161 = vmatprep.subr.bf16.mxu0 %v1572_v52 }
 0x11c   : > { %1162 = vmatpush1.bf16.msra.mxu0 %v1570_v53 }
 0x11d   : > { %1163 = vmatprep.subr.bf16.mxu0 %v1575_v54 }
 0x120   : > { %1164 = vmatpush1.bf16.msra.mxu0 %v1573_v55 }
 0x121   : > { %1165 = vmatprep.subr.bf16.mxu0 %v1578_v56 }
 0x124   : > { %1166 = vmatpush1.bf16.msra.mxu0 %v1576_v57 }
 0x125   : > { %1167 = vmatprep.subr.bf16.mxu0 %v1581_v11 }
 0x128   : > { %1168 = vmatpush1.bf16.msra.mxu0 %v1579_v12 }
 0x129   : > { %1169 = vmatprep.subr.bf16.mxu0 %v1584_v13 }
 0x12c   : > { %1170 = vmatpush1.bf16.msra.mxu0 %v1582_v14 }
 0x1c2   : > { %v671_v61 = vpop.f32.mrb[0].mxu0 }
 0x1c3   : > { %v672_v62 = vadd.f32 %v671_v61, %v470_v59  ;;  %v673_v63 = vpop.f32.mrb[1].mxu0 }
 0x1c4   : > { %v674_v2 = vadd.f32 %v673_v63, %v474_v60  ;;  %v675_v3 = vpop.f32.mrb[2].mxu0 }
 0x1c5   : > { %v678_v4 = vmax.f32 %v672_v62, 0.0  ;;  %v676_v5 = vpop.f32.mrb[3].mxu0 }
 0x1c6   : > { %v679_v6 = vmax.f32 %v674_v2, 0.0 }
 0x1c7   : > { %v680_v7 = vadd.f32 %v678_v4, %v1893_v21 }
 0x1c8   : > { %v681_v8 = vadd.f32 %v679_v6, %v1895_v22 }
 0x1c9   : > { %v682_v10 = vpack.c.bf16 %v680_v7, %v680_v7 }
 0x1ca   : > { %v683_v9 = vpack.c.bf16 %v681_v8, %v681_v8 }
 0x1cc   : > { %920 = vmatprep.mubr.bf16.mxu1 %v683_v9 }
 0x1cd   : > { %921 = vmatmul.mubr.bf16.vlgmr.msra.gmra.mrb[0].mxu1 %v682_v10 }
 0x2a0   : > { %v922_v18 = vpop.f32.mrb[0].mxu1 }
 0x2a1   : > { %v923_v19 = vadd.f32 %v922_v18, %v721_v16  ;;  %v924_v20 = vpop.f32.mrb[1].mxu1 }
 0x2a2   : > { %v925_v21 = vadd.f32 %v924_v20, %v725_v17  ;;  %v926_v22 = vpop.f32.mrb[2].mxu1 }
 0x2a3   : > { %v929_v23 = vmax.f32 %v923_v19, 0.0  ;;  %v927_v24 = vpop.f32.mrb[3].mxu1 }
 0x2a4   : > { %v930_v25 = vmax.f32 %v925_v21, 0.0 }
 0x2a5   : > { %v931_v26 = vadd.f32 %v929_v23, %v680_v7 }
 0x2a6   : > { %v932_v27 = vadd.f32 %v930_v25, %v681_v8 }
 0x2a7   : > { %v933_v29 = vpack.c.bf16 %v931_v26, %v931_v26 }
 0x2a8   : > { %v934_v28 = vpack.c.bf16 %v932_v27, %v932_v27 }
 0x2aa   : > { %1171 = vmatprep.mubr.bf16.mxu0 %v934_v28 }
 0x2ab   : > { %1172 = vmatmul.mubr.bf16.vlgmr.msra.gmra.mrb[4].mxu0 %v933_v29 }
 0x37e   : > { %v1173_v33 = vpop.f32.mrb[4].mxu0 }
 0x37f   : > { %v1174_v34 = vadd.f32 %v1173_v33, %v972_v31  ;;  %v1175_v35 = vpop.f32.mrb[5].mxu0 }
 0x380   : > { %v1176_v36 = vadd.f32 %v1175_v35, %v976_v32  ;;  %v1177_v37 = vpop.f32.mrb[6].mxu0 }
 0x381   : > { %v1391_v38 = vmul.f32 -1.442695, %v1174_v34  ;;  %v1178_v39 = vpop.f32.mrb[7].mxu0 }
 0x382   : > { %v1392_v40 = vmul.f32 -1.442695, %v1176_v36 }
 0x383   : > { %1585 = vpow2.f32 %v1391_v38 }
 0x384   : > { %1587 = vpow2.f32 %v1392_v40 }
 0x38d   : > { %v1586_v41 = vpop.eup %1585 }
 0x38e   : > { %v1588_v42 = vpop.eup %1587  ;;  %v1186_v43 = vadd.f32 1.0, %v1586_v41 }
 0x38f   : > { %v1187_v44 = vadd.f32 1.0, %v1588_v42 }
 0x390   : > { %1589 = vrcp.f32 %v1186_v43 }
 0x391   : > { %1591 = vrcp.f32 %v1187_v44 }
 0x39a   : > { %v1590_v0 = vpop.eup %1589 }
 0x39b   : > { %v1592_v1 = vpop.eup %1591  ;;  %1192 = vst [vmem:[%s373_s11] sm:$0xff] %v1590_v0 }
 0x39c   : > { %1193 = vst [vmem:[%s373_s11 + $0x8] sm:$0xff] %v1592_v1 }
 0x39d PF: > { %s21_s30 = sadd.s32 1, %s1691_s30  }
 0x39e   : > { %p18_p5 = scmp.ge.s32.totalorder %s21_s30, 4  }
 0x3a0   :  { %20 = sbr.rel (!%p18_p5) target bundleno = 2 (0x2), region = 100 }
 0x3a7   :  { %1215 = vsyncpa [#allocation3], 1 }
 0x3a8   :  { %1217 = vsyncpa [#allocation3 + $0x1], 1 }
 0x3a9   :  { %1218 = vsyncpa [#allocation5], 1 }

</bundles_post_ra>
